<compile_context>
chip_gen: v7x
topology: tpu7x:2x2x1
jax: 0.10.0
libtpu: 0.0.40
codegen_flags: <defaults>
</compile_context>

<pallas_src>
import jax
import jax.numpy as jnp
from jax.experimental import pallas as pl
from jax.experimental.pallas import tpu as pltpu

K = 3          # conv kernel size
C_HID = 32     # conv channels
_TB_CAP = 4096 # batch-tile cap (keeps everything far under scoped VMEM on all gens)


def critic_kernel(x_ref, w1_ref, b1_ref, w2_ref, b2_ref, wfc_ref, bfc_ref, out_ref):
    # x_ref:   (TB, Cin*L)        batch tile of flattened input (native dtype)
    # w1_ref:  (Cin*L, 32*L)      dense-equivalent conv1 (zero padding folded in)
    # w2_ref:  (32*L, 32*L)       dense-equivalent conv2
    # b1_ref/b2_ref: (1, 32*L)    per-output-position biases
    # wfc_ref: (1, 32*L)          fc2 weight row
    # bfc_ref: (1, 1) in SMEM     fc2 bias scalar
    # out_ref: (1, 1, TB)         lane-dense (batch-on-lanes) output row for this tile
    x = x_ref[...].astype(jnp.float32)
    h1 = jnp.maximum(
        jnp.dot(x, w1_ref[...], preferred_element_type=jnp.float32) + b1_ref[...], 0.0)
    h2 = jnp.maximum(
        jnp.dot(h1, w2_ref[...], preferred_element_type=jnp.float32) + b2_ref[...], 0.0)
    # Linear(64 -> 1): VPU multiply + cross-lane (XLU) reduction instead of an MXU
    # matmul with one result column; the result lands batch-on-lanes for a
    # lane-dense store.
    y = jnp.sum(h2 * wfc_ref[...], axis=-1) + bfc_ref[0, 0]      # (TB,)
    out_ref[...] = y[None, None, :]


def _conv1d_as_dense(w, L):
    """Dense equivalent of Conv1d(k=3, stride=1, padding=1) acting on the
    channel-major (index = c*L + l) flatten.  w: (Cout, Cin, K) -> (Cin*L, Cout*L)."""
    Cout, Cin, Kk = w.shape
    lin = jnp.arange(L)[:, None]                 # input position
    lout = jnp.arange(L)[None, :]                # output position
    kidx = lin - lout + 1                        # tap index connecting (lin, lout)
    valid = ((kidx >= 0) & (kidx < Kk)).astype(w.dtype)
    wg = w[:, :, jnp.clip(kidx, 0, Kk - 1)] * valid[None, None, :, :]   # (Cout, Cin, L, L)
    # rows indexed by c*L + lin, cols by o*L + lout
    return jnp.transpose(wg, (1, 2, 0, 3)).reshape(Cin * L, Cout * L)


def prepare_dense_params(params):
    """One-time precompute of the dense-equivalent weights.

    Hoisted out of the per-call forward (per perf review): call once per
    parameter set and reuse the result across forward calls."""
    w1, b1, w2, b2, wfc, bfc = params
    f32 = jnp.float32
    L = wfc.shape[1] // C_HID            # forward() requires 32*L == fc2 in_features
    W1 = _conv1d_as_dense(w1.astype(f32), L)                      # (Cin*L, 32*L)
    W2 = _conv1d_as_dense(w2.astype(f32), L)                      # (32*L, 32*L)
    b1e = jnp.repeat(b1.astype(f32), L).reshape(1, C_HID * L)     # index o*L + l -> b1[o]
    b2e = jnp.repeat(b2.astype(f32), L).reshape(1, C_HID * L)
    wfc_row = wfc.astype(f32).reshape(1, C_HID * L)               # (1, 32*L)
    bfc_s = bfc.astype(f32).reshape(1, 1)
    return W1, b1e, W2, b2e, wfc_row, bfc_s


def _round_up(n, m):
    return ((n + m - 1) // m) * m


def _choose_tb(B):
    """Batch-tile size: as large as possible (each grid step costs ~0.35 us of
    fixed overhead while the whole working set is ~tens of KB), a multiple of 8
    (sublane), and chosen so the grid has >= 2 steps when B allows it so v7x's
    two TensorCores can split the 'parallel' axis."""
    if B <= 16:
        return _round_up(B, 8)
    return min(_TB_CAP, _round_up(-(-B // 2), 8))


@jax.jit
def critic_forward(x, dense_params):
    """x: (B, Cin, L) in PyTorch NCL layout; dense_params from prepare_dense_params."""
    W1, b1e, W2, b2e, wfc_row, bfc_s = dense_params
    B, Cin, L = x.shape
    F = Cin * L
    H = C_HID * L
    assert W1.shape == (F, H), "input shape inconsistent with prepared params"
    assert wfc_row.shape == (1, H), "fc2 expects 32*L inputs (PyTorch forward needs L == 2)"

    # Native NCL flatten (index c*L + l) is exactly the row order the effective
    # weights were built for; keep x's dtype (no forced f32 on the HBM stream).
    x_flat = x.reshape(B, F)

    TB = _choose_tb(B)
    grid = -(-B // TB)
    B_pad = grid * TB
    if B_pad != B:
        # Zero-pad the batch up to a tile multiple; padded rows produce
        # bias/ReLU-driven garbage that is sliced off below (never summed).
        x_flat = jnp.pad(x_flat, ((0, B_pad - B), (0, 0)))

    def bcast(shape):
        return pl.BlockSpec(shape, lambda i: (0,) * len(shape))

    out = pl.pallas_call(
        critic_kernel,
        out_shape=jax.ShapeDtypeStruct((grid, 1, TB), jnp.float32),
        grid=(grid,),
        in_specs=[
            pl.BlockSpec((TB, F), lambda i: (i, 0)),             # batch-tiled input
            bcast((F, H)),                                       # W1_eff (broadcast)
            bcast((1, H)),                                       # b1_eff
            bcast((H, H)),                                       # W2_eff
            bcast((1, H)),                                       # b2_eff
            bcast((1, H)),                                       # fc2 weight row
            pl.BlockSpec(memory_space=pltpu.MemorySpace.SMEM),   # fc2 bias scalar
        ],
        # one lane-dense (batch-on-lanes) row per grid step
        out_specs=pl.BlockSpec((1, 1, TB), lambda i: (i, 0, 0)),
        compiler_params=pltpu.CompilerParams(dimension_semantics=("parallel",)),
    )(x_flat, W1, b1e, W2, b2e, wfc_row, bfc_s)

    # (grid, 1, TB) -> (B_pad, 1) is a free, contiguous reshape; drop padded rows.
    return out.reshape(B_pad, 1)[:B]


def ref_forward(x, params):
    """Pure-JAX reference mirroring the PyTorch forward (NCL layout)."""
    w1, b1, w2, b2, wfc, bfc = params

    def conv1d(x, w, b):
        B, C, L = x.shape
        xp = jnp.pad(x, ((0, 0), (0, 0), (1, 1)))
        out = sum(jnp.einsum('bcl,oc->bol', xp[:, :, k:k + L], w[:, :, k])
                  for k in range(w.shape[2]))
        return out + b[None, :, None]

    h = jax.nn.relu(conv1d(x, w1, b1))
    h = jax.nn.relu(conv1d(h, w2, b2))
    h = h.reshape(x.shape[0], -1)          # PyTorch view(B, 32*L): index c*L + l
    return h @ wfc.T + bfc[None, :]


if __name__ == "__main__":
    key = jax.random.PRNGKey(0)
    B, Cin, L = 2, 4, 2    # input_dim = (4, 2); forward requires 32*L == 64

    ks = jax.random.split(key, 7)
    w1 = jax.random.normal(ks[0], (C_HID, Cin, K), jnp.float32) * 0.1
    b1 = jax.random.normal(ks[1], (C_HID,), jnp.float32) * 0.1
    w2 = jax.random.normal(ks[2], (C_HID, C_HID, K), jnp.float32) * 0.1
    b2 = jax.random.normal(ks[3], (C_HID,), jnp.float32) * 0.1
    wfc = jax.random.normal(ks[4], (1, C_HID * L), jnp.float32) * 0.1   # fc2
    bfc = jax.random.normal(ks[5], (1,), jnp.float32) * 0.1
    # fc1 (Linear(32*L, 64)) is constructed in PyTorch __init__ but never used
    # in forward(); it is intentionally omitted here.
    # TODO(synk): fc1 has no runtime role in forward(); nothing to translate.

    x = jax.random.normal(ks[6], (B, Cin, L), jnp.float32)
    params = (w1, b1, w2, b2, wfc, bfc)

    dense = prepare_dense_params(params)     # one-time weight prep (hoisted)
    out = jax.block_until_ready(critic_forward(x, dense))
    ref = ref_forward(x, params)

    assert out.shape == (B, 1), out.shape
    assert jnp.allclose(out, ref, atol=1e-5, rtol=1e-5), (out, ref)
    print("KERNEL_OK")
</pallas_src>

<mosaic_0001>
module attributes {stable_mosaic.version = 11 : i64} {
  func.func @critic_kernel(%arg0: i32, %arg1: memref<8x8xf32, #tpu.memory_space<vmem>>, %arg2: memref<8x64xf32, #tpu.memory_space<vmem>>, %arg3: memref<1x64xf32, #tpu.memory_space<vmem>>, %arg4: memref<64x64xf32, #tpu.memory_space<vmem>>, %arg5: memref<1x64xf32, #tpu.memory_space<vmem>>, %arg6: memref<1x64xf32, #tpu.memory_space<vmem>>, %arg7: memref<1x1xf32, #tpu.memory_space<smem>>, %arg8: memref<1x1x8xf32, #tpu.memory_space<vmem>>) attributes {dimension_semantics = [#tpu.dimension_semantics<parallel>], iteration_bounds = array<i64: 1>, scalar_prefetch = 0 : i64, scratch_operands = 0 : i64, tpu.core_type = #tpu.core_type<tc>, window_params = [{transform_indices = @transform_0, window_bounds = array<i64: 8, 8>}, {pipeline_mode = #tpu.pipeline_mode<synchronous>, transform_indices = @transform_1, window_bounds = array<i64: 8, 64>}, {pipeline_mode = #tpu.pipeline_mode<synchronous>, transform_indices = @transform_2, window_bounds = array<i64: 1, 64>}, {pipeline_mode = #tpu.pipeline_mode<synchronous>, transform_indices = @transform_3, window_bounds = array<i64: 64, 64>}, {pipeline_mode = #tpu.pipeline_mode<synchronous>, transform_indices = @transform_4, window_bounds = array<i64: 1, 64>}, {pipeline_mode = #tpu.pipeline_mode<synchronous>, transform_indices = @transform_5, window_bounds = array<i64: 1, 64>}, {transform_indices = @transform_6, window_bounds = array<i64: 1, 1>}, {transform_indices = @transform_7, window_bounds = array<i64: 1, 1, 8>}]} {
    %c0 = arith.constant 0 : index
    %c0_0 = arith.constant 0 : index
    %0 = vector.load %arg1[%c0, %c0_0] : memref<8x8xf32, #tpu.memory_space<vmem>>, vector<8x8xf32>
    %c0_1 = arith.constant 0 : index
    %c0_2 = arith.constant 0 : index
    %1 = vector.load %arg2[%c0_1, %c0_2] : memref<8x64xf32, #tpu.memory_space<vmem>>, vector<8x64xf32>
    %cst = arith.constant dense<0.000000e+00> : vector<8x64xf32>
    %2 = tpu.matmul %0, %1, %cst {dimension_numbers = #tpu.dot_dimension_numbers<[1], [0], [0], [1], [0, 0, 1, 1], [], []>} : vector<8x8xf32>, vector<8x64xf32>, vector<8x64xf32> -> vector<8x64xf32>
    %c0_3 = arith.constant 0 : index
    %c0_4 = arith.constant 0 : index
    %3 = vector.load %arg3[%c0_3, %c0_4] : memref<1x64xf32, #tpu.memory_space<vmem>>, vector<1x64xf32>
    %4 = vector.broadcast %3 : vector<1x64xf32> to vector<8x64xf32>
    %5 = arith.addf %2, %4 : vector<8x64xf32>
    %cst_5 = arith.constant 0.000000e+00 : f32
    %6 = vector.broadcast %cst_5 : f32 to vector<8x64xf32>
    %7 = arith.maximumf %5, %6 : vector<8x64xf32>
    %c0_6 = arith.constant 0 : index
    %c0_7 = arith.constant 0 : index
    %8 = vector.load %arg4[%c0_6, %c0_7] : memref<64x64xf32, #tpu.memory_space<vmem>>, vector<64x64xf32>
    %cst_8 = arith.constant dense<0.000000e+00> : vector<8x64xf32>
    %9 = tpu.matmul %7, %8, %cst_8 {dimension_numbers = #tpu.dot_dimension_numbers<[1], [0], [0], [1], [0, 0, 1, 1], [], []>} : vector<8x64xf32>, vector<64x64xf32>, vector<8x64xf32> -> vector<8x64xf32>
    %c0_9 = arith.constant 0 : index
    %c0_10 = arith.constant 0 : index
    %10 = vector.load %arg5[%c0_9, %c0_10] : memref<1x64xf32, #tpu.memory_space<vmem>>, vector<1x64xf32>
    %11 = vector.broadcast %10 : vector<1x64xf32> to vector<8x64xf32>
    %12 = arith.addf %9, %11 : vector<8x64xf32>
    %cst_11 = arith.constant 0.000000e+00 : f32
    %13 = vector.broadcast %cst_11 : f32 to vector<8x64xf32>
    %14 = arith.maximumf %12, %13 : vector<8x64xf32>
    %c0_12 = arith.constant 0 : index
    %c0_13 = arith.constant 0 : index
    %15 = vector.load %arg6[%c0_12, %c0_13] : memref<1x64xf32, #tpu.memory_space<vmem>>, vector<1x64xf32>
    %16 = vector.broadcast %15 : vector<1x64xf32> to vector<8x64xf32>
    %17 = arith.mulf %14, %16 : vector<8x64xf32>
    %cst_14 = arith.constant dense<0.000000e+00> : vector<8xf32>
    %18 = vector.multi_reduction <add>, %17, %cst_14 [1] : vector<8x64xf32> to vector<8xf32>
    %c0_15 = arith.constant 0 : index
    %c0_16 = arith.constant 0 : index
    %19 = memref.load %arg7[%c0_15, %c0_16] : memref<1x1xf32, #tpu.memory_space<smem>>
    %20 = vector.broadcast %19 : f32 to vector<8xf32>
    %21 = arith.addf %18, %20 : vector<8xf32>
    %22 = vector.shape_cast %21 : vector<8xf32> to vector<1x1x8xf32>
    %c0_17 = arith.constant 0 : index
    %c0_18 = arith.constant 0 : index
    %c0_19 = arith.constant 0 : index
    %23 = vector.load %arg8[%c0_17, %c0_18, %c0_19] : memref<1x1x8xf32, #tpu.memory_space<vmem>>, vector<1x1x8xf32>
    tpu.vector_store %arg8[%c0_17, %c0_18, %c0_19], %22 {strides = array<i32>} : memref<1x1x8xf32, #tpu.memory_space<vmem>>, vector<1x1x8xf32>,
    return
  }
  func.func @transform_0(%arg0: i32) -> (i32, i32) {
    %c0_i32 = arith.constant 0 : i32
    %c0_i32_0 = arith.constant 0 : i32
    return %arg0, %c0_i32 : i32, i32
  }
  func.func @transform_1(%arg0: i32) -> (i32, i32) {
    %c0_i32 = arith.constant 0 : i32
    %c0_i32_0 = arith.constant 0 : i32
    %c0_i32_1 = arith.constant 0 : i32
    return %c0_i32, %c0_i32_0 : i32, i32
  }
  func.func @transform_2(%arg0: i32) -> (i32, i32) {
    %c0_i32 = arith.constant 0 : i32
    %c0_i32_0 = arith.constant 0 : i32
    %c0_i32_1 = arith.constant 0 : i32
    return %c0_i32, %c0_i32_0 : i32, i32
  }
  func.func @transform_3(%arg0: i32) -> (i32, i32) {
    %c0_i32 = arith.constant 0 : i32
    %c0_i32_0 = arith.constant 0 : i32
    %c0_i32_1 = arith.constant 0 : i32
    return %c0_i32, %c0_i32_0 : i32, i32
  }
  func.func @transform_4(%arg0: i32) -> (i32, i32) {
    %c0_i32 = arith.constant 0 : i32
    %c0_i32_0 = arith.constant 0 : i32
    %c0_i32_1 = arith.constant 0 : i32
    return %c0_i32, %c0_i32_0 : i32, i32
  }
  func.func @transform_5(%arg0: i32) -> (i32, i32) {
    %c0_i32 = arith.constant 0 : i32
    %c0_i32_0 = arith.constant 0 : i32
    %c0_i32_1 = arith.constant 0 : i32
    return %c0_i32, %c0_i32_0 : i32, i32
  }
  func.func @transform_6(%arg0: i32) -> (i32, i32) {
    %c0_i32 = arith.constant 0 : i32
    %c0_i32_0 = arith.constant 0 : i32
    %c0_i32_1 = arith.constant 0 : i32
    return %c0_i32, %c0_i32_0 : i32, i32
  }
  func.func @transform_7(%arg0: i32) -> (i32, i32, i32) {
    %c0_i32 = arith.constant 0 : i32
    %c0_i32_0 = arith.constant 0 : i32
    %c0_i32_1 = arith.constant 0 : i32
    return %arg0, %c0_i32, %c0_i32_0 : i32, i32, i32
  }
}

</mosaic_0001>

<bundles_post_ra>
// kernel: critic_forward.1
= control target key start
LH: loop header
LB: loop body
LE: loop exit
PB: predicated region body
PF: predicated region fallthrough
CT: control target
= control target key end

     0   :  { %13 = vsyncpa [#allocation4], 0  ;;  %s326_s24 = smov [#allocation3]   ;;  %s405_s0 = inlined_call_operand.vmem [shape: f32[8,8], index: 0, kind: input, shape index: {}]   ;;  %s406_s1 = inlined_call_operand.vmem [shape: f32[8,64], index: 1, kind: input, shape index: {}]   ;;  %s407_s2 = inlined_call_operand.vmem [shape: f32[1,64], index: 2, kind: input, shape index: {}]   ;;  %s408_s3 = inlined_call_operand.hbm [shape: f32[64,64], index: 3, kind: input, shape index: {}]   ;;  %s409_s4 = inlined_call_operand.vmem [shape: f32[1,64], index: 4, kind: input, shape index: {}]   ;;  %s410_s5 = inlined_call_operand.vmem [shape: f32[1,64], index: 5, kind: input, shape index: {}]   ;;  %s411_s6 = inlined_call_operand.<no memory space> [shape: f32[1,1], index: 6, kind: input, shape index: {}]   ;;  %s412_s7 = inlined_call_operand.vmem [shape: f32[1,1,8], index: 7, kind: output, shape index: {}]  }
   0x1   :  { %s25_s25 = sshll.u32 %s326_s24, 4  ;;  %s302_s28 = scalar_lea.hbm %s408_s3, 1024  ;;  %s26_s25 = int_to_ptr.vmem [resolvable:$true] %s25_s25 }
   0x2   :  { %p303_p0 = scmp.ne.s32.totalorder %s408_s3, %s302_s28  ;;  %p306_p1 = scmp.lt.u32.totalorder %s302_s28, %s408_s3 }
   0x4   :  { %p308_p2 = pnand %p306_p1, %p303_p0 }
   0x6   :  { %311 = shalt.err (!%p308_p2)
}
   0x7   :  { %s312_s10 = scalar_lea.vmem %s26_s25, 1024  ;;  %p317_p4 = scmp.lt.s32.totalorder %s26_s25, %s26_s25 }
   0x8   :  { %p313_p3 = scmp.ne.s32.totalorder %s26_s25, %s312_s10  ;;  %p318_p5 = scmp.lt.s32.totalorder %s312_s10, %s312_s10 }
   0xa   :  { %p319_p6 = por %p318_p5, %p317_p4 }
   0xc   :  { %p320_p7 = pnand %p319_p6, %p313_p3 }
   0xe   :  { %323 = shalt.err (!%p320_p7)
}
   0xf   :  { %s327_s11 = smov 128   ;;  %s328_s12 = smov 8  }
  0x10   :  { %31 = dma.hbm_to_vmem [thread:$0]  %s408_s3, 1024, %s26_s25, [#allocation4], %s327_s11, %s327_s11, %s328_s12  }
  0x11   :  { %324 = dma.done.wait [#allocation4], 1024  }
  0x12   :  { %325 = vsyncadd [#allocation4], 4294966272  ;;  %v329_v0 = vmov 0.0   ;;  %vm330_vm0 = vmmov 0   ;;  %v331_v1 = vmov 0.0|0.0   ;;  %vm50_vm1 = vcmask 64512  }
  0x13   :  { %260 = vmatprep.subr.mxu0 %v329_v0  ;;  %262 = vmatprep.mubr.msk.f32.mxu0 %vm330_vm0, %v329_v0  ;;  %v42_v2 = vld [vmem:[%s406_s1] sm:$0xff]  ;;  %v126_v5 = vld [vmem:[#allocation3 + $0x8] sm:$0xff]  ;;  %v127_v6 = vld [vmem:[#allocation3 + $0x10] sm:$0xff]  ;;  %vm140_vm2 = vcmask 523264   ;;  %v230_v29 = vlaneseq  ;;  %v227_v32 = vstv %s411_s6  ;;  %vm237_vm3 = vcmask 57344  }
  0x14   :  { %284 = vmatprep.subr.bf16.mxu1 %v331_v1  ;;  %281 = vmatprep.mubr.msk.f32.mxu1 %vm330_vm0, %v329_v0  ;;  %v41_v3 = vld [vmem:[%s405_s0] sm:$0xff]  ;;  %v128_v7 = vld [vmem:[#allocation3 + $0x18] sm:$0xff]  ;;  %v130_v11 = vld [vmem:[#allocation3 + $0x28] sm:$0xff] }
  0x15   :  { %v125_v4 = vld [vmem:[#allocation3] sm:$0xff]  ;;  %261 = vmatpush3.msra.mxu0 %v42_v2  ;;  %v288_v9 = vpack.c.bf16 %v128_v7, %v127_v6  ;;  %v131_v13 = vld [vmem:[#allocation3 + $0x30] sm:$0xff]  ;;  %v132_v14 = vld [vmem:[#allocation3 + $0x38] sm:$0xff]  ;;  %v231_v30 = vand.u32 127, %v230_v29  ;;  %v233_v31 = vshrl.u32 %v230_v29, 7 }
  0x16   :  { %263 = vmatmul.mubr.msk.f32.vlgmr.msra.gmra.mrb[0].mxu0 %vm50_vm1, %v41_v3  ;;  %v285_v8 = vpack.c.bf16 %v126_v5, %v125_v4  ;;  %v129_v10 = vld [vmem:[#allocation3 + $0x20] sm:$0xff]  ;;  %v294_v15 = vpack.c.bf16 %v132_v14, %v131_v13 }
  0x17   :  { %v291_v12 = vpack.c.bf16 %v130_v11, %v129_v10  ;;  %v244_v16 = vld [vmem:[%s407_s2] ss:$0 sm:$0xff]  ;;  %v234_v33 = vsub.s32 %v231_v30, %v233_v31 }
  0x18   :  { %286 = vmatpush3.bf16.msra.mxu1 %v285_v8  ;;  %v246_v21 = vld [vmem:[%s409_s4] ss:$0 sm:$0xff] }
  0x19   :  { %287 = vmatprep.subr.bf16.mxu1 %v331_v1  ;;  %v248_v25 = vld [vmem:[%s410_s5] ss:$0 sm:$0xff] }
  0x1c   :  { %289 = vmatpush3.bf16.msra.mxu1 %v288_v9 }
  0x1d   :  { %290 = vmatprep.subr.bf16.mxu1 %v331_v1 }
  0x20   :  { %292 = vmatpush3.bf16.msra.mxu1 %v291_v12 }
  0x21   :  { %293 = vmatprep.subr.bf16.mxu1 %v331_v1 }
  0x24   :  { %295 = vmatpush3.bf16.msra.mxu1 %v294_v15 }
  0xe9   :  { %v120_v17 = vpop.f32.mrb[0].mxu0 }
  0xea   :  { %v121_v18 = vadd.f32 %v244_v16, %v120_v17  ;;  %v264_v19 = vpop.f32.mrb[1].mxu0 }
  0xec   :  { %v124_v20 = vmax.f32 %v121_v18, 0.0 }
  0xee   :  { %282 = vmatmul.mubr.msk.f32.vlgmr.msra.gmra.mrb[0].mxu1 %vm140_vm2, %v124_v20 }
 0x1c1   :  { %v210_v22 = vpop.f32.mrb[0].mxu1 }
 0x1c2   :  { %v211_v23 = vadd.f32 %v246_v21, %v210_v22  ;;  %v283_v24 = vpop.f32.mrb[1].mxu1 }
 0x1c4   :  { %v214_v26 = vmax.f32 %v211_v23, 0.0 }
 0x1c6   :  { %v222_v27 = vmul.f32 %v248_v25, %v214_v26 }
 0x1c8   :  { %v223_v28 = vsel %vm140_vm2, %v222_v27, 0.0 }
 0x1c9   :  { %224 = vadd.xlane.f32.xlu0 %v223_v28 }
 0x256   :  { %v225_v34 = vpop.xlane.xlu0 %224 }
 0x257   :  { %v228_v35 = vadd.f32 %v227_v32, %v225_v34 }
 0x259   :  { %v235_v36 = vrot.slane %v228_v35, %v234_v33 }
 0x25b   :  { %238 = vst.msk [vmem:[%s412_s7] sm:$0x1] %vm237_vm3, %v235_v36 }
 0x25c   :  { %243 = vsyncpa [#allocation4], 1 }

</bundles_post_ra>
